<compile_context>
chip_gen: v6e
topology: v6e:2x2x1
jax: 0.10.0
libtpu: 0.0.40
codegen_flags: <defaults>
</compile_context>

<pallas_src>
import functools

import jax
import jax.numpy as jnp
from jax.experimental import pallas as pl
from jax.experimental.pallas import tpu as pltpu


def _round_up(x, m):
    return (x + m - 1) // m * m


def _conv_gemm_kernel(x_ref, w_ref, b_ref, o_ref):
    # x_ref: (TILE_M, K*idim) bf16   im2col patches for this row tile
    # w_ref: (K*idim, odim_p) bf16   fused conv weight (resident across grid)
    # b_ref: (1, odim_p)      f32    bias (resident across grid)
    # o_ref: (TILE_M, odim_p) f32    lane-dense output tile
    acc = jnp.dot(x_ref[...], w_ref[...], preferred_element_type=jnp.float32)
    acc = acc + b_ref[...]                      # bias in the f32 epilogue
    # F.leaky_relu(x, negative_slope=0.0) == relu(x)
    o_ref[...] = jnp.maximum(acc, 0.0).astype(o_ref.dtype)


@functools.partial(jax.jit, static_argnames=("kernel_size", "stride", "pad"))
def conv1d_subsampling(x, x_len, weight, bias, *, kernel_size, stride, pad):
    """Pallas implementation of Conv1dSubsampling.forward.

    x:      (B, T, idim) float32
    x_len:  (B,) int32 or None
    weight: (odim, idim, K) float32   (PyTorch Conv1d weight layout)
    bias:   (odim,) float32
    pad:    (pad_left, pad_right)
    """
    B, T, idim = x.shape
    odim, idim_w, K = weight.shape
    assert idim == idim_w and K == kernel_size
    pad_l, pad_r = pad

    t_pad = T + pad_l + pad_r
    t_out = (t_pad - K) // stride + 1
    kd = K * idim
    m = B * t_out

    compute_dtype = jnp.bfloat16

    # --- wrapper-side layout plumbing (fused by XLA under jit) -------------------
    # Cast to bf16 first so the ConstantPad1d pass writes half-width data (the cast
    # is required anyway for the bf16 MXU), then build the im2col patch slab once.
    x_pad = jnp.pad(x.astype(compute_dtype), ((0, 0), (pad_l, pad_r), (0, 0)))
    span = (t_out - 1) * stride + 1
    patches = jnp.concatenate(
        [x_pad[:, k:k + span:stride, :] for k in range(K)], axis=-1)  # (B, t_out, K*idim)
    patches = patches.reshape(m, kd)

    # Row tiling: big tiles for pipelining, but never larger than the problem.
    tile_m = 512
    if m < tile_m:
        tile_m = _round_up(m, 8)
    m_p = _round_up(m, tile_m)
    if m_p > m:
        patches = jnp.pad(patches, ((0, m_p - m), (0, 0)))

    # Lane-pad odim to a multiple of 128 so every store is an unmasked vst.
    odim_p = _round_up(odim, 128)
    w2 = jnp.transpose(weight, (2, 1, 0)).reshape(kd, odim)          # tap-major rows
    w2 = jnp.pad(w2, ((0, 0), (0, odim_p - odim))).astype(compute_dtype)
    b2 = jnp.pad(bias, (0, odim_p - odim)).astype(jnp.float32).reshape(1, odim_p)

    grid = (m_p // tile_m,)
    out = pl.pallas_call(
        _conv_gemm_kernel,
        out_shape=jax.ShapeDtypeStruct((m_p, odim_p), jnp.float32),
        grid_spec=pltpu.PrefetchScalarGridSpec(
            num_scalar_prefetch=0,
            grid=grid,
            in_specs=[
                pl.BlockSpec((tile_m, kd), lambda i: (i, 0)),
                pl.BlockSpec((kd, odim_p), lambda i: (0, 0)),   # weight stays resident
                pl.BlockSpec((1, odim_p), lambda i: (0, 0)),    # bias stays resident
            ],
            out_specs=pl.BlockSpec((tile_m, odim_p), lambda i: (i, 0)),
        ),
        compiler_params=pltpu.CompilerParams(
            dimension_semantics=("parallel",)),
    )(patches, w2, b2)

    out = out[:m, :odim].reshape(B, t_out, odim)

    if x_len is None:
        return out, None
    new_len = (x_len - 1) // stride + 1
    return out, new_len


def _reference(x, x_len, weight, bias, *, kernel_size, stride, pad):
    """Pure-JAX reference matching the PyTorch semantics."""
    pad_l, pad_r = pad
    x_pad = jnp.pad(x, ((0, 0), (pad_l, pad_r), (0, 0)))
    t_pad = x_pad.shape[1]
    t_out = (t_pad - kernel_size) // stride + 1
    w_km = jnp.transpose(weight, (2, 1, 0))                 # (K, idim, odim)
    span = (t_out - 1) * stride + 1
    acc = sum(
        jnp.einsum("btd,do->bto", x_pad[:, k:k + span:stride, :], w_km[k],
                   preferred_element_type=jnp.float32)
        for k in range(kernel_size))
    out = jnp.maximum(acc + bias[None, None, :], 0.0)
    new_len = None if x_len is None else (x_len - 1) // stride + 1
    return out, new_len


if __name__ == "__main__":
    # Module hyperparameters (small, consistent with Conv1dSubsampling.__init__).
    idim, odim = 16, 32
    kernel_size, stride, pad = 3, 2, (1, 1)
    B, T = 2, 16

    key = jax.random.PRNGKey(0)
    kx, kw, kb = jax.random.split(key, 3)
    x = jax.random.normal(kx, (B, T, idim), dtype=jnp.float32)
    x_len = jnp.array([16, 12], dtype=jnp.int32)
    # Deterministic parameters (torch Conv1d weight layout: (odim, idim, K)).
    weight = jax.random.normal(kw, (odim, idim, kernel_size), dtype=jnp.float32) * 0.1
    bias = jax.random.normal(kb, (odim,), dtype=jnp.float32) * 0.1

    out, out_len = conv1d_subsampling(
        x, x_len, weight, bias,
        kernel_size=kernel_size, stride=stride, pad=pad)
    out = jax.block_until_ready(out)
    out_len = jax.block_until_ready(out_len)

    # Reference on bf16-rounded operands (the kernel computes bf16 x bf16 -> f32 on
    # the MXU, which is exact per-product; only summation order differs).
    x_q = x.astype(jnp.bfloat16).astype(jnp.float32)
    w_q = weight.astype(jnp.bfloat16).astype(jnp.float32)
    ref_out, ref_len = _reference(
        x_q, x_len, w_q, bias,
        kernel_size=kernel_size, stride=stride, pad=pad)

    t_out = (T + sum(pad) - kernel_size) // stride + 1
    assert out.shape == (B, t_out, odim)
    assert jnp.allclose(out, ref_out, atol=1e-3, rtol=1e-3), \
        float(jnp.max(jnp.abs(out - ref_out)))
    assert jnp.array_equal(out_len, ref_len)

    print("KERNEL_OK")
</pallas_src>

<mosaic_0001>
module attributes {stable_mosaic.version = 11 : i64} {
  func.func @_conv_gemm_kernel(%arg0: i32, %arg1: memref<16x48xbf16, #tpu.memory_space<vmem>>, %arg2: memref<48x128xbf16, #tpu.memory_space<vmem>>, %arg3: memref<1x128xf32, #tpu.memory_space<vmem>>, %arg4: memref<16x128xf32, #tpu.memory_space<vmem>>) attributes {dimension_semantics = [#tpu.dimension_semantics<parallel>], iteration_bounds = array<i64: 1>, scalar_prefetch = 0 : i64, scratch_operands = 0 : i64, tpu.core_type = #tpu.core_type<tc>, window_params = [{transform_indices = @transform_0, window_bounds = array<i64: 16, 48>}, {pipeline_mode = #tpu.pipeline_mode<synchronous>, transform_indices = @transform_1, window_bounds = array<i64: 48, 128>}, {pipeline_mode = #tpu.pipeline_mode<synchronous>, transform_indices = @transform_2, window_bounds = array<i64: 1, 128>}, {transform_indices = @transform_3, window_bounds = array<i64: 16, 128>}]} {
    %c0 = arith.constant 0 : index
    %c0_0 = arith.constant 0 : index
    %0 = vector.load %arg1[%c0, %c0_0] : memref<16x48xbf16, #tpu.memory_space<vmem>>, vector<16x48xbf16>
    %c0_1 = arith.constant 0 : index
    %c0_2 = arith.constant 0 : index
    %1 = vector.load %arg2[%c0_1, %c0_2] : memref<48x128xbf16, #tpu.memory_space<vmem>>, vector<48x128xbf16>
    %cst = arith.constant dense<0.000000e+00> : vector<16x128xf32>
    %2 = tpu.matmul %0, %1, %cst {dimension_numbers = #tpu.dot_dimension_numbers<[1], [0], [0], [1], [0, 0, 1, 1], [], []>} : vector<16x48xbf16>, vector<48x128xbf16>, vector<16x128xf32> -> vector<16x128xf32>
    %c0_3 = arith.constant 0 : index
    %c0_4 = arith.constant 0 : index
    %3 = vector.load %arg3[%c0_3, %c0_4] : memref<1x128xf32, #tpu.memory_space<vmem>>, vector<1x128xf32>
    %4 = vector.broadcast %3 : vector<1x128xf32> to vector<16x128xf32>
    %5 = arith.addf %2, %4 : vector<16x128xf32>
    %cst_5 = arith.constant 0.000000e+00 : f32
    %6 = vector.broadcast %cst_5 : f32 to vector<16x128xf32>
    %7 = arith.maximumf %5, %6 : vector<16x128xf32>
    %c0_6 = arith.constant 0 : index
    %c0_7 = arith.constant 0 : index
    %8 = vector.load %arg4[%c0_6, %c0_7] : memref<16x128xf32, #tpu.memory_space<vmem>>, vector<16x128xf32>
    tpu.vector_store %arg4[%c0_6, %c0_7], %7 {strides = array<i32>} : memref<16x128xf32, #tpu.memory_space<vmem>>, vector<16x128xf32>,
    return
  }
  func.func @transform_0(%arg0: i32) -> (i32, i32) {
    %c0_i32 = arith.constant 0 : i32
    %c0_i32_0 = arith.constant 0 : i32
    return %arg0, %c0_i32 : i32, i32
  }
  func.func @transform_1(%arg0: i32) -> (i32, i32) {
    %c0_i32 = arith.constant 0 : i32
    %c0_i32_0 = arith.constant 0 : i32
    %c0_i32_1 = arith.constant 0 : i32
    return %c0_i32, %c0_i32_0 : i32, i32
  }
  func.func @transform_2(%arg0: i32) -> (i32, i32) {
    %c0_i32 = arith.constant 0 : i32
    %c0_i32_0 = arith.constant 0 : i32
    %c0_i32_1 = arith.constant 0 : i32
    return %c0_i32, %c0_i32_0 : i32, i32
  }
  func.func @transform_3(%arg0: i32) -> (i32, i32) {
    %c0_i32 = arith.constant 0 : i32
    %c0_i32_0 = arith.constant 0 : i32
    return %arg0, %c0_i32 : i32, i32
  }
}

</mosaic_0001>

<bundles_post_ra>
// kernel: conv1d_subsampling.1
= control target key start
LH: loop header
LB: loop body
LE: loop exit
PB: predicated region body
PF: predicated region fallthrough
CT: control target
= control target key end

     0   :  { %v132_v0 = vmov 0.0   ;;  %vm133_vm0 = vmmov 0   ;;  %vm53_vm1 = vcmask 392192   ;;  %s175_s1 = inlined_call_operand.vmem [shape: bf16[48,128], index: 1, kind: input, shape index: {}]   ;;  %s176_s0 = inlined_call_operand.vmem [shape: bf16[16,48], index: 0, kind: input, shape index: {}]   ;;  %s177_s2 = inlined_call_operand.vmem [shape: f32[1,128], index: 2, kind: input, shape index: {}]   ;;  %s178_s3 = inlined_call_operand.vmem [shape: f32[16,128], index: 3, kind: output, shape index: {}]  }
   0x1   :  { %116 = vmatprep.subr.bf16.mxu0 %v132_v0  ;;  %v128_v1 = vld [vmem:[%s175_s1 + $0x10] sm:$0xff]   ;;  %122 = vmatprep.mubr.msk.bf16.mxu0 %vm133_vm0, %v132_v0  ;;  %v129_v2 = vld [vmem:[%s175_s1 + $0x8] sm:$0xff]   ;;  %v130_v3 = vld [vmem:[%s175_s1] sm:$0xff]  }
   0x2   :  { %117 = vmatpush3.bf16.msra.mxu0 %v128_v1  ;;  %v131_v4 = vld [vmem:[%s176_s0] sm:$0xff]  }
   0x3   :  { %118 = vmatprep.subr.bf16.mxu0 %v132_v0  ;;  %v106_v5 = vld [vmem:[%s177_s2] ss:$0 sm:$0xff] }
   0x6   :  { %119 = vmatpush3.bf16.msra.mxu0 %v129_v2 }
   0x7   :  { %120 = vmatprep.subr.bf16.mxu0 %v132_v0 }
   0xa   :  { %121 = vmatpush3.bf16.msra.mxu0 %v130_v3 }
   0xd   :  { %123 = vmatmul.mubr.msk.bf16.vlgmr.msra.gmra.mxu0 %vm53_vm1, %v131_v4 }
  0xcd   :  { %v91_v6 = vpop.f32.mrf.mxu0 }
  0xce   :  { %v92_v7 = vadd.f32 %v106_v5, %v91_v6 }
  0xcf   :  { %v124_v8 = vpop.f32.mrf.mxu0 }
  0xd0   :  { %v98_v9 = vmax.f32 %v92_v7, 0.0 }
  0xd1   :  { %v94_v10 = vpop.f32.mrf.mxu0 }
  0xd2   :  { %100 = vst [vmem:[%s178_s3] sm:$0xff] %v98_v9  ;;  %v95_v11 = vadd.f32 %v106_v5, %v94_v10 }
  0xd3   :  { %v125_v12 = vpop.f32.mrf.mxu0 }
  0xd4   :  { %v99_v13 = vmax.f32 %v95_v11, 0.0 }
  0xd6   :  { %101 = vst [vmem:[%s178_s3 + $0x8] sm:$0xff] %v99_v13 }

</bundles_post_ra>
